<compile_context>
chip_gen: v7x
topology: tpu7x:2x2x1
jax: 0.10.0
libtpu: 0.0.40
codegen_flags: <defaults>
</compile_context>

<pallas_src>
import functools
from typing import Dict, List

import jax
import jax.numpy as jnp
import numpy as np
from jax.experimental import pallas as pl
from jax.experimental.pallas import tpu as pltpu


# ----------------------------------------------------------------------------
# Fused decoder kernel (single pallas_call, no grid)
# ----------------------------------------------------------------------------

def _fused_decoder_kernel(
    ego_ref, calib_ref, q_ref,
    ego_w1_ref, ego_b1_ref, ego_w2_ref, ego_b2_ref,
    cal_w1_ref, cal_b1_ref, cal_w2_ref, cal_b2_ref,
    anc_w1_ref, anc_b1_ref, anc_w2_ref, anc_b2_ref,
    ref_w1_ref, ref_b1_ref, ref_w2_ref, ref_b2_ref,
    head_w_ref, head_b_ref,
    out_ref,
):
    """Whole TrajectoryDecoder hot path fused into one kernel invocation.

    All operands are full-extent VMEM blocks.  Matmul inputs are bf16
    (MXU-native), accumulation / bias / ReLU / residual stay in f32.  The
    merged (trajectory | class) head writes one lane-dense [B*Q, 128] slab per
    layer, so the store path never emits masked partial stores.
    """
    def dot(a, w):
        # w is already bf16 (packed host-side); cast the activation only.
        return jnp.dot(a.astype(jnp.bfloat16), w,
                       preferred_element_type=jnp.float32)

    def mlp2(x, w1, b1, w2, b2):
        h = jnp.maximum(dot(x, w1) + b1, 0.0)
        return dot(h, w2) + b2

    # --- context / anchor encoders -------------------------------------------
    ego_feat = mlp2(ego_ref[...], ego_w1_ref[...], ego_b1_ref[...],
                    ego_w2_ref[...], ego_b2_ref[...])            # [B, F]
    calib_feat = mlp2(calib_ref[...], cal_w1_ref[...], cal_b1_ref[...],
                      cal_w2_ref[...], cal_b2_ref[...])          # [B, F]
    q_feat = mlp2(q_ref[...], anc_w1_ref[...], anc_b1_ref[...],
                  anc_w2_ref[...], anc_b2_ref[...])              # [Q, F]

    # Broadcast the per-batch context onto every query: feat is [B*Q, F].
    ctx = ego_feat + calib_feat                                  # [B, F]
    batch = ctx.shape[0]
    feat = jnp.concatenate(
        [q_feat + ctx[b:b + 1, :] for b in range(batch)], axis=0)

    # --- iterative refinement layers + merged heads ---------------------------
    num_layers = out_ref.shape[0]
    for l in range(num_layers):                                  # small static L
        h = jnp.maximum(dot(feat, ref_w1_ref[l]) + ref_b1_ref[l], 0.0)
        feat = feat + dot(h, ref_w2_ref[l]) + ref_b2_ref[l]      # residual, f32
        head = dot(feat, head_w_ref[l]) + head_b_ref[l]          # [B*Q, 128]
        out_ref[l] = head.astype(out_ref.dtype)


def run_fused_decoder(ego_flat, calib_flat, queries, packed, num_layers):
    """One pallas_call for the whole decoder. Output: [L, B*Q, N_pad] f32."""
    m = ego_flat.shape[0] * queries.shape[0]
    n_pad = packed[-1].shape[-1]
    return pl.pallas_call(
        _fused_decoder_kernel,
        out_shape=jax.ShapeDtypeStruct((num_layers, m, n_pad), jnp.float32),
        # No grid / BlockSpecs: whole arrays live as single VMEM blocks
        # (total footprint << 1 MiB, fine even on v7x's 64 MiB VMEM).
        compiler_params=pltpu.CompilerParams(vmem_limit_bytes=32 * 1024 * 1024),
    )(ego_flat, calib_flat, queries, *packed)


# ----------------------------------------------------------------------------
# Parameter construction + packing (deterministic, in-script)
# ----------------------------------------------------------------------------

def _dense_params(key, k, n, scale=0.02):
    kw, _ = jax.random.split(key)
    w = scale * jax.random.normal(kw, (k, n), dtype=jnp.float32)
    b = jnp.zeros((n,), dtype=jnp.float32) + 0.01
    return w, b


def init_decoder_params(key, num_layers, num_queries, feature_dim, query_dim,
                        hidden_dim, num_points, ego_in_dim, calib_in_dim,
                        num_classes):
    keys = jax.random.split(key, 8 + 4 * num_layers)
    it = iter(keys)
    params = {}
    params["queries"] = 0.02 * jax.random.normal(
        next(it), (num_queries, query_dim), dtype=jnp.float32)
    params["anchor_w1"], params["anchor_b1"] = _dense_params(next(it), query_dim, hidden_dim)
    params["anchor_w2"], params["anchor_b2"] = _dense_params(next(it), hidden_dim, feature_dim)
    params["ego_w1"], params["ego_b1"] = _dense_params(next(it), ego_in_dim, hidden_dim)
    params["ego_w2"], params["ego_b2"] = _dense_params(next(it), hidden_dim, feature_dim)
    params["calib_w1"], params["calib_b1"] = _dense_params(next(it), calib_in_dim, hidden_dim)
    params["calib_w2"], params["calib_b2"] = _dense_params(next(it), hidden_dim, feature_dim)
    params["layers"] = []
    for _ in range(num_layers):
        lp = {}
        lp["ref_w1"], lp["ref_b1"] = _dense_params(next(it), feature_dim, hidden_dim)
        lp["ref_w2"], lp["ref_b2"] = _dense_params(next(it), hidden_dim, feature_dim)
        lp["traj_w"], lp["traj_b"] = _dense_params(next(it), feature_dim, num_points * 3)
        lp["cls_w"], lp["cls_b"] = _dense_params(next(it), feature_dim, num_classes)
        params["layers"].append(lp)
    return params


def pack_params(params):
    """Stack per-layer weights, merge+pad heads to a lane-dense 128 width,
    cast matmul weights to bf16 (biases stay f32)."""
    def w(x):
        return x.astype(jnp.bfloat16)

    def b(x):
        return x.reshape(1, -1).astype(jnp.float32)

    layers = params["layers"]
    ref_w1 = jnp.stack([w(lp["ref_w1"]) for lp in layers])          # [L, F, H]
    ref_b1 = jnp.stack([b(lp["ref_b1"]) for lp in layers])          # [L, 1, H]
    ref_w2 = jnp.stack([w(lp["ref_w2"]) for lp in layers])          # [L, H, F]
    ref_b2 = jnp.stack([b(lp["ref_b2"]) for lp in layers])          # [L, 1, F]

    n_head = layers[0]["traj_w"].shape[1] + layers[0]["cls_w"].shape[1]
    n_pad = ((n_head + 127) // 128) * 128
    head_w_list, head_b_list = [], []
    for lp in layers:
        hw = jnp.concatenate([lp["traj_w"], lp["cls_w"]], axis=1)   # [F, n_head]
        hb = jnp.concatenate([lp["traj_b"], lp["cls_b"]], axis=0)   # [n_head]
        hw = jnp.pad(hw, ((0, 0), (0, n_pad - n_head)))
        hb = jnp.pad(hb, ((0, n_pad - n_head),))
        head_w_list.append(w(hw))
        head_b_list.append(hb.reshape(1, -1).astype(jnp.float32))
    head_w = jnp.stack(head_w_list)                                 # [L, F, 128]
    head_b = jnp.stack(head_b_list)                                 # [L, 1, 128]

    return (
        w(params["ego_w1"]), b(params["ego_b1"]),
        w(params["ego_w2"]), b(params["ego_b2"]),
        w(params["calib_w1"]), b(params["calib_b1"]),
        w(params["calib_w2"]), b(params["calib_b2"]),
        w(params["anchor_w1"]), b(params["anchor_b1"]),
        w(params["anchor_w2"]), b(params["anchor_b2"]),
        ref_w1, ref_b1, ref_w2, ref_b2, head_w, head_b,
    )


# ----------------------------------------------------------------------------
# Forward pass (E2EPerceptionNet.forward semantics), fully jitted
# ----------------------------------------------------------------------------

@functools.partial(jax.jit,
                   static_argnames=("num_layers", "num_points", "num_classes"))
def e2e_perception_forward(packed, queries, batch, *, num_layers, num_points,
                           num_classes) -> List[Dict[str, jnp.ndarray]]:
    ego_states = batch["ego_states"]              # [B, T, E]
    calibrations = batch["calibrations"]          # dict cam -> [B, P]
    B = ego_states.shape[0]
    Q = queries.shape[0]

    ego_flat = ego_states.reshape(B, -1)
    calib_flat = jnp.concatenate(
        [calibrations[k] for k in sorted(calibrations)], axis=-1)

    slab = run_fused_decoder(ego_flat, calib_flat, queries, packed, num_layers)

    n_traj = num_points * 3
    traj = slab[:, :, :n_traj].reshape(num_layers, B, Q, num_points, 3)
    scores = slab[:, :, n_traj:n_traj + num_classes].reshape(
        num_layers, B, Q, num_classes)
    return [{"trajectories": traj[l], "scores": scores[l]}
            for l in range(num_layers)]


# ----------------------------------------------------------------------------
# Pure-JAX reference of the same math (for a numerics check in __main__)
# ----------------------------------------------------------------------------

def reference_decoder(ego_flat, calib_flat, queries, packed, num_layers):
    (ew1, eb1, ew2, eb2, cw1, cb1, cw2, cb2, aw1, ab1, aw2, ab2,
     rw1, rb1, rw2, rb2, hw, hb) = packed

    def dot(a, w):
        return jnp.dot(a.astype(jnp.bfloat16), w,
                       preferred_element_type=jnp.float32)

    def mlp2(x, w1, b1, w2, b2):
        return dot(jnp.maximum(dot(x, w1) + b1, 0.0), w2) + b2

    ego = mlp2(ego_flat, ew1, eb1, ew2, eb2)
    cal = mlp2(calib_flat, cw1, cb1, cw2, cb2)
    qf = mlp2(queries, aw1, ab1, aw2, ab2)
    ctx = ego + cal
    B = ctx.shape[0]
    feat = jnp.concatenate([qf + ctx[b:b + 1, :] for b in range(B)], axis=0)
    outs = []
    for l in range(num_layers):
        h = jnp.maximum(dot(feat, rw1[l]) + rb1[l], 0.0)
        feat = feat + dot(h, rw2[l]) + rb2[l]
        outs.append(dot(feat, hw[l]) + hb[l])
    return jnp.stack(outs)


# ----------------------------------------------------------------------------
# Main
# ----------------------------------------------------------------------------

if __name__ == "__main__":
    NUM_LAYERS = 2
    NUM_QUERIES = 16
    FEATURE_DIM = 32
    QUERY_DIM = 32
    HIDDEN_DIM = 32
    NUM_POINTS = 8
    NUM_CLASSES = 4

    B = 2           # batch
    T = 4           # temporal frames
    EGO_DIM = 10    # EgoStateIndex.END_OF_INDEX (synthetic)
    CAM_DIM = 12    # CameraParamIndex.END_OF_INDEX (synthetic)
    CAMS = ("CAM_FRONT", "CAM_LEFT")

    key = jax.random.PRNGKey(0)
    k_par, k_ego, k_c0, k_c1 = jax.random.split(key, 4)

    params = init_decoder_params(
        k_par, NUM_LAYERS, NUM_QUERIES, FEATURE_DIM, QUERY_DIM, HIDDEN_DIM,
        NUM_POINTS, ego_in_dim=T * EGO_DIM, calib_in_dim=len(CAMS) * CAM_DIM,
        num_classes=NUM_CLASSES)
    packed = pack_params(params)
    queries = params["queries"]

    batch = {
        "ego_states": jax.random.normal(k_ego, (B, T, EGO_DIM), dtype=jnp.float32),
        "calibrations": {
            CAMS[0]: jax.random.normal(k_c0, (B, CAM_DIM), dtype=jnp.float32),
            CAMS[1]: jax.random.normal(k_c1, (B, CAM_DIM), dtype=jnp.float32),
        },
        # 'images' is accepted by the PyTorch module but unused in forward.
    }

    outputs = e2e_perception_forward(
        packed, queries, batch,
        num_layers=NUM_LAYERS, num_points=NUM_POINTS, num_classes=NUM_CLASSES)
    jax.block_until_ready(jax.tree_util.tree_leaves(outputs))

    # Shape checks (same contract as the previous version).
    assert len(outputs) == NUM_LAYERS
    assert outputs[0]["trajectories"].shape == (B, NUM_QUERIES, NUM_POINTS, 3)
    assert outputs[0]["scores"].shape == (B, NUM_QUERIES, NUM_CLASSES)

    # Numerics check: fused kernel vs pure-JAX reference of the same math.
    ego_flat = batch["ego_states"].reshape(B, -1)
    calib_flat = jnp.concatenate(
        [batch["calibrations"][k] for k in sorted(batch["calibrations"])], axis=-1)
    slab_kernel = run_fused_decoder(ego_flat, calib_flat, queries, packed, NUM_LAYERS)
    slab_ref = reference_decoder(ego_flat, calib_flat, queries, packed, NUM_LAYERS)
    np.testing.assert_allclose(np.asarray(slab_kernel), np.asarray(slab_ref),
                               rtol=1e-2, atol=1e-2)

    print("KERNEL_OK")
</pallas_src>

<mosaic_0001>
module attributes {stable_mosaic.version = 11 : i64} {
  func.func @_fused_decoder_kernel(%arg0: memref<2x40xf32, #tpu.memory_space<vmem>>, %arg1: memref<2x24xf32, #tpu.memory_space<vmem>>, %arg2: memref<16x32xf32, #tpu.memory_space<vmem>>, %arg3: memref<40x32xbf16, #tpu.memory_space<vmem>>, %arg4: memref<1x32xf32, #tpu.memory_space<vmem>>, %arg5: memref<32x32xbf16, #tpu.memory_space<vmem>>, %arg6: memref<1x32xf32, #tpu.memory_space<vmem>>, %arg7: memref<24x32xbf16, #tpu.memory_space<vmem>>, %arg8: memref<1x32xf32, #tpu.memory_space<vmem>>, %arg9: memref<32x32xbf16, #tpu.memory_space<vmem>>, %arg10: memref<1x32xf32, #tpu.memory_space<vmem>>, %arg11: memref<32x32xbf16, #tpu.memory_space<vmem>>, %arg12: memref<1x32xf32, #tpu.memory_space<vmem>>, %arg13: memref<32x32xbf16, #tpu.memory_space<vmem>>, %arg14: memref<1x32xf32, #tpu.memory_space<vmem>>, %arg15: memref<2x32x32xbf16, #tpu.memory_space<vmem>>, %arg16: memref<2x1x32xf32, #tpu.memory_space<vmem>>, %arg17: memref<2x32x32xbf16, #tpu.memory_space<vmem>>, %arg18: memref<2x1x32xf32, #tpu.memory_space<vmem>>, %arg19: memref<2x32x128xbf16, #tpu.memory_space<vmem>>, %arg20: memref<2x1x128xf32, #tpu.memory_space<vmem>>, %arg21: memref<2x32x128xf32, #tpu.memory_space<vmem>>) attributes {dimension_semantics = [], scalar_prefetch = 0 : i64, scratch_operands = 0 : i64, tpu.core_type = #tpu.core_type<tc>} {
    %c0 = arith.constant 0 : index
    %c0_0 = arith.constant 0 : index
    %0 = vector.load %arg0[%c0, %c0_0] : memref<2x40xf32, #tpu.memory_space<vmem>>, vector<2x40xf32>
    %c0_1 = arith.constant 0 : index
    %c0_2 = arith.constant 0 : index
    %1 = vector.load %arg3[%c0_1, %c0_2] : memref<40x32xbf16, #tpu.memory_space<vmem>>, vector<40x32xbf16>
    %c0_3 = arith.constant 0 : index
    %c0_4 = arith.constant 0 : index
    %2 = vector.load %arg4[%c0_3, %c0_4] : memref<1x32xf32, #tpu.memory_space<vmem>>, vector<1x32xf32>
    %c0_5 = arith.constant 0 : index
    %c0_6 = arith.constant 0 : index
    %3 = vector.load %arg5[%c0_5, %c0_6] : memref<32x32xbf16, #tpu.memory_space<vmem>>, vector<32x32xbf16>
    %c0_7 = arith.constant 0 : index
    %c0_8 = arith.constant 0 : index
    %4 = vector.load %arg6[%c0_7, %c0_8] : memref<1x32xf32, #tpu.memory_space<vmem>>, vector<1x32xf32>
    %5 = arith.truncf %0 : vector<2x40xf32> to vector<2x40xbf16>
    %cst = arith.constant dense<0.000000e+00> : vector<2x32xf32>
    %6 = tpu.matmul %5, %1, %cst {dimension_numbers = #tpu.dot_dimension_numbers<[1], [0], [0], [1], [0, 0, 1, 1], [], []>} : vector<2x40xbf16>, vector<40x32xbf16>, vector<2x32xf32> -> vector<2x32xf32>
    %7 = vector.broadcast %2 : vector<1x32xf32> to vector<2x32xf32>
    %8 = arith.addf %6, %7 : vector<2x32xf32>
    %cst_9 = arith.constant 0.000000e+00 : f32
    %9 = vector.broadcast %cst_9 : f32 to vector<2x32xf32>
    %10 = arith.maximumf %8, %9 : vector<2x32xf32>
    %11 = arith.truncf %10 : vector<2x32xf32> to vector<2x32xbf16>
    %cst_10 = arith.constant dense<0.000000e+00> : vector<2x32xf32>
    %12 = tpu.matmul %11, %3, %cst_10 {dimension_numbers = #tpu.dot_dimension_numbers<[1], [0], [0], [1], [0, 0, 1, 1], [], []>} : vector<2x32xbf16>, vector<32x32xbf16>, vector<2x32xf32> -> vector<2x32xf32>
    %13 = vector.broadcast %4 : vector<1x32xf32> to vector<2x32xf32>
    %14 = arith.addf %12, %13 : vector<2x32xf32>
    %c0_11 = arith.constant 0 : index
    %c0_12 = arith.constant 0 : index
    %15 = vector.load %arg1[%c0_11, %c0_12] : memref<2x24xf32, #tpu.memory_space<vmem>>, vector<2x24xf32>
    %c0_13 = arith.constant 0 : index
    %c0_14 = arith.constant 0 : index
    %16 = vector.load %arg7[%c0_13, %c0_14] : memref<24x32xbf16, #tpu.memory_space<vmem>>, vector<24x32xbf16>
    %c0_15 = arith.constant 0 : index
    %c0_16 = arith.constant 0 : index
    %17 = vector.load %arg8[%c0_15, %c0_16] : memref<1x32xf32, #tpu.memory_space<vmem>>, vector<1x32xf32>
    %c0_17 = arith.constant 0 : index
    %c0_18 = arith.constant 0 : index
    %18 = vector.load %arg9[%c0_17, %c0_18] : memref<32x32xbf16, #tpu.memory_space<vmem>>, vector<32x32xbf16>
    %c0_19 = arith.constant 0 : index
    %c0_20 = arith.constant 0 : index
    %19 = vector.load %arg10[%c0_19, %c0_20] : memref<1x32xf32, #tpu.memory_space<vmem>>, vector<1x32xf32>
    %20 = arith.truncf %15 : vector<2x24xf32> to vector<2x24xbf16>
    %cst_21 = arith.constant dense<0.000000e+00> : vector<2x32xf32>
    %21 = tpu.matmul %20, %16, %cst_21 {dimension_numbers = #tpu.dot_dimension_numbers<[1], [0], [0], [1], [0, 0, 1, 1], [], []>} : vector<2x24xbf16>, vector<24x32xbf16>, vector<2x32xf32> -> vector<2x32xf32>
    %22 = vector.broadcast %17 : vector<1x32xf32> to vector<2x32xf32>
    %23 = arith.addf %21, %22 : vector<2x32xf32>
    %cst_22 = arith.constant 0.000000e+00 : f32
    %24 = vector.broadcast %cst_22 : f32 to vector<2x32xf32>
    %25 = arith.maximumf %23, %24 : vector<2x32xf32>
    %26 = arith.truncf %25 : vector<2x32xf32> to vector<2x32xbf16>
    %cst_23 = arith.constant dense<0.000000e+00> : vector<2x32xf32>
    %27 = tpu.matmul %26, %18, %cst_23 {dimension_numbers = #tpu.dot_dimension_numbers<[1], [0], [0], [1], [0, 0, 1, 1], [], []>} : vector<2x32xbf16>, vector<32x32xbf16>, vector<2x32xf32> -> vector<2x32xf32>
    %28 = vector.broadcast %19 : vector<1x32xf32> to vector<2x32xf32>
    %29 = arith.addf %27, %28 : vector<2x32xf32>
    %c0_24 = arith.constant 0 : index
    %c0_25 = arith.constant 0 : index
    %30 = vector.load %arg2[%c0_24, %c0_25] : memref<16x32xf32, #tpu.memory_space<vmem>>, vector<16x32xf32>
    %c0_26 = arith.constant 0 : index
    %c0_27 = arith.constant 0 : index
    %31 = vector.load %arg11[%c0_26, %c0_27] : memref<32x32xbf16, #tpu.memory_space<vmem>>, vector<32x32xbf16>
    %c0_28 = arith.constant 0 : index
    %c0_29 = arith.constant 0 : index
    %32 = vector.load %arg12[%c0_28, %c0_29] : memref<1x32xf32, #tpu.memory_space<vmem>>, vector<1x32xf32>
    %c0_30 = arith.constant 0 : index
    %c0_31 = arith.constant 0 : index
    %33 = vector.load %arg13[%c0_30, %c0_31] : memref<32x32xbf16, #tpu.memory_space<vmem>>, vector<32x32xbf16>
    %c0_32 = arith.constant 0 : index
    %c0_33 = arith.constant 0 : index
    %34 = vector.load %arg14[%c0_32, %c0_33] : memref<1x32xf32, #tpu.memory_space<vmem>>, vector<1x32xf32>
    %35 = arith.truncf %30 : vector<16x32xf32> to vector<16x32xbf16>
    %cst_34 = arith.constant dense<0.000000e+00> : vector<16x32xf32>
    %36 = tpu.matmul %35, %31, %cst_34 {dimension_numbers = #tpu.dot_dimension_numbers<[1], [0], [0], [1], [0, 0, 1, 1], [], []>} : vector<16x32xbf16>, vector<32x32xbf16>, vector<16x32xf32> -> vector<16x32xf32>
    %37 = vector.broadcast %32 : vector<1x32xf32> to vector<16x32xf32>
    %38 = arith.addf %36, %37 : vector<16x32xf32>
    %cst_35 = arith.constant 0.000000e+00 : f32
    %39 = vector.broadcast %cst_35 : f32 to vector<16x32xf32>
    %40 = arith.maximumf %38, %39 : vector<16x32xf32>
    %41 = arith.truncf %40 : vector<16x32xf32> to vector<16x32xbf16>
    %cst_36 = arith.constant dense<0.000000e+00> : vector<16x32xf32>
    %42 = tpu.matmul %41, %33, %cst_36 {dimension_numbers = #tpu.dot_dimension_numbers<[1], [0], [0], [1], [0, 0, 1, 1], [], []>} : vector<16x32xbf16>, vector<32x32xbf16>, vector<16x32xf32> -> vector<16x32xf32>
    %43 = vector.broadcast %34 : vector<1x32xf32> to vector<16x32xf32>
    %44 = arith.addf %42, %43 : vector<16x32xf32>
    %45 = arith.addf %14, %29 : vector<2x32xf32>
    %46 = vector.extract_strided_slice %45 {offsets = [0, 0], sizes = [1, 32], strides = [1, 1]} : vector<2x32xf32> to vector<1x32xf32>
    %47 = vector.broadcast %46 : vector<1x32xf32> to vector<16x32xf32>
    %48 = arith.addf %44, %47 : vector<16x32xf32>
    %49 = vector.extract_strided_slice %45 {offsets = [1, 0], sizes = [1, 32], strides = [1, 1]} : vector<2x32xf32> to vector<1x32xf32>
    %50 = vector.broadcast %49 : vector<1x32xf32> to vector<16x32xf32>
    %51 = arith.addf %44, %50 : vector<16x32xf32>
    %52 = tpu.concatenate %48, %51 in 0 : vector<16x32xf32>, vector<16x32xf32> -> vector<32x32xf32>
    %c0_37 = arith.constant 0 : index
    %c0_38 = arith.constant 0 : index
    %c0_39 = arith.constant 0 : index
    %53 = vector.load %arg15[%c0_37, %c0_38, %c0_39] : memref<2x32x32xbf16, #tpu.memory_space<vmem>>, vector<1x32x32xbf16>
    %54 = vector.shape_cast %53 : vector<1x32x32xbf16> to vector<32x32xbf16>
    %55 = arith.truncf %52 : vector<32x32xf32> to vector<32x32xbf16>
    %cst_40 = arith.constant dense<0.000000e+00> : vector<32x32xf32>
    %56 = tpu.matmul %55, %54, %cst_40 {dimension_numbers = #tpu.dot_dimension_numbers<[1], [0], [0], [1], [0, 0, 1, 1], [], []>} : vector<32x32xbf16>, vector<32x32xbf16>, vector<32x32xf32> -> vector<32x32xf32>
    %c0_41 = arith.constant 0 : index
    %c0_42 = arith.constant 0 : index
    %c0_43 = arith.constant 0 : index
    %57 = vector.load %arg16[%c0_41, %c0_42, %c0_43] : memref<2x1x32xf32, #tpu.memory_space<vmem>>, vector<1x1x32xf32>
    %58 = vector.shape_cast %57 : vector<1x1x32xf32> to vector<1x32xf32>
    %59 = vector.broadcast %58 : vector<1x32xf32> to vector<32x32xf32>
    %60 = arith.addf %56, %59 : vector<32x32xf32>
    %cst_44 = arith.constant 0.000000e+00 : f32
    %61 = vector.broadcast %cst_44 : f32 to vector<32x32xf32>
    %62 = arith.maximumf %60, %61 : vector<32x32xf32>
    %c0_45 = arith.constant 0 : index
    %c0_46 = arith.constant 0 : index
    %c0_47 = arith.constant 0 : index
    %63 = vector.load %arg17[%c0_45, %c0_46, %c0_47] : memref<2x32x32xbf16, #tpu.memory_space<vmem>>, vector<1x32x32xbf16>
    %64 = vector.shape_cast %63 : vector<1x32x32xbf16> to vector<32x32xbf16>
    %65 = arith.truncf %62 : vector<32x32xf32> to vector<32x32xbf16>
    %cst_48 = arith.constant dense<0.000000e+00> : vector<32x32xf32>
    %66 = tpu.matmul %65, %64, %cst_48 {dimension_numbers = #tpu.dot_dimension_numbers<[1], [0], [0], [1], [0, 0, 1, 1], [], []>} : vector<32x32xbf16>, vector<32x32xbf16>, vector<32x32xf32> -> vector<32x32xf32>
    %67 = arith.addf %52, %66 : vector<32x32xf32>
    %c0_49 = arith.constant 0 : index
    %c0_50 = arith.constant 0 : index
    %c0_51 = arith.constant 0 : index
    %68 = vector.load %arg18[%c0_49, %c0_50, %c0_51] : memref<2x1x32xf32, #tpu.memory_space<vmem>>, vector<1x1x32xf32>
    %69 = vector.shape_cast %68 : vector<1x1x32xf32> to vector<1x32xf32>
    %70 = vector.broadcast %69 : vector<1x32xf32> to vector<32x32xf32>
    %71 = arith.addf %67, %70 : vector<32x32xf32>
    %c0_52 = arith.constant 0 : index
    %c0_53 = arith.constant 0 : index
    %c0_54 = arith.constant 0 : index
    %72 = vector.load %arg19[%c0_52, %c0_53, %c0_54] : memref<2x32x128xbf16, #tpu.memory_space<vmem>>, vector<1x32x128xbf16>
    %73 = vector.shape_cast %72 : vector<1x32x128xbf16> to vector<32x128xbf16>
    %74 = arith.truncf %71 : vector<32x32xf32> to vector<32x32xbf16>
    %cst_55 = arith.constant dense<0.000000e+00> : vector<32x128xf32>
    %75 = tpu.matmul %74, %73, %cst_55 {dimension_numbers = #tpu.dot_dimension_numbers<[1], [0], [0], [1], [0, 0, 1, 1], [], []>} : vector<32x32xbf16>, vector<32x128xbf16>, vector<32x128xf32> -> vector<32x128xf32>
    %c0_56 = arith.constant 0 : index
    %c0_57 = arith.constant 0 : index
    %c0_58 = arith.constant 0 : index
    %76 = vector.load %arg20[%c0_56, %c0_57, %c0_58] : memref<2x1x128xf32, #tpu.memory_space<vmem>>, vector<1x1x128xf32>
    %77 = vector.shape_cast %76 : vector<1x1x128xf32> to vector<1x128xf32>
    %78 = vector.broadcast %77 : vector<1x128xf32> to vector<32x128xf32>
    %79 = arith.addf %75, %78 : vector<32x128xf32>
    %c0_59 = arith.constant 0 : index
    %c0_60 = arith.constant 0 : index
    %c0_61 = arith.constant 0 : index
    %80 = vector.load %arg21[%c0_59, %c0_60, %c0_61] : memref<2x32x128xf32, #tpu.memory_space<vmem>>, vector<1x32x128xf32>
    %81 = vector.shape_cast %80 : vector<1x32x128xf32> to vector<32x128xf32>
    %82 = vector.shape_cast %79 : vector<32x128xf32> to vector<1x32x128xf32>
    tpu.vector_store %arg21[%c0_59, %c0_60, %c0_61], %82 {strides = array<i32>} : memref<2x32x128xf32, #tpu.memory_space<vmem>>, vector<1x32x128xf32>,
    %c1 = arith.constant 1 : index
    %c0_62 = arith.constant 0 : index
    %c0_63 = arith.constant 0 : index
    %83 = vector.load %arg15[%c1, %c0_62, %c0_63] : memref<2x32x32xbf16, #tpu.memory_space<vmem>>, vector<1x32x32xbf16>
    %84 = vector.shape_cast %83 : vector<1x32x32xbf16> to vector<32x32xbf16>
    %85 = arith.truncf %71 : vector<32x32xf32> to vector<32x32xbf16>
    %cst_64 = arith.constant dense<0.000000e+00> : vector<32x32xf32>
    %86 = tpu.matmul %85, %84, %cst_64 {dimension_numbers = #tpu.dot_dimension_numbers<[1], [0], [0], [1], [0, 0, 1, 1], [], []>} : vector<32x32xbf16>, vector<32x32xbf16>, vector<32x32xf32> -> vector<32x32xf32>
    %c1_65 = arith.constant 1 : index
    %c0_66 = arith.constant 0 : index
    %c0_67 = arith.constant 0 : index
    %87 = vector.load %arg16[%c1_65, %c0_66, %c0_67] : memref<2x1x32xf32, #tpu.memory_space<vmem>>, vector<1x1x32xf32>
    %88 = vector.shape_cast %87 : vector<1x1x32xf32> to vector<1x32xf32>
    %89 = vector.broadcast %88 : vector<1x32xf32> to vector<32x32xf32>
    %90 = arith.addf %86, %89 : vector<32x32xf32>
    %cst_68 = arith.constant 0.000000e+00 : f32
    %91 = vector.broadcast %cst_68 : f32 to vector<32x32xf32>
    %92 = arith.maximumf %90, %91 : vector<32x32xf32>
    %c1_69 = arith.constant 1 : index
    %c0_70 = arith.constant 0 : index
    %c0_71 = arith.constant 0 : index
    %93 = vector.load %arg17[%c1_69, %c0_70, %c0_71] : memref<2x32x32xbf16, #tpu.memory_space<vmem>>, vector<1x32x32xbf16>
    %94 = vector.shape_cast %93 : vector<1x32x32xbf16> to vector<32x32xbf16>
    %95 = arith.truncf %92 : vector<32x32xf32> to vector<32x32xbf16>
    %cst_72 = arith.constant dense<0.000000e+00> : vector<32x32xf32>
    %96 = tpu.matmul %95, %94, %cst_72 {dimension_numbers = #tpu.dot_dimension_numbers<[1], [0], [0], [1], [0, 0, 1, 1], [], []>} : vector<32x32xbf16>, vector<32x32xbf16>, vector<32x32xf32> -> vector<32x32xf32>
    %97 = arith.addf %71, %96 : vector<32x32xf32>
    %c1_73 = arith.constant 1 : index
    %c0_74 = arith.constant 0 : index
    %c0_75 = arith.constant 0 : index
    %98 = vector.load %arg18[%c1_73, %c0_74, %c0_75] : memref<2x1x32xf32, #tpu.memory_space<vmem>>, vector<1x1x32xf32>
    %99 = vector.shape_cast %98 : vector<1x1x32xf32> to vector<1x32xf32>
    %100 = vector.broadcast %99 : vector<1x32xf32> to vector<32x32xf32>
    %101 = arith.addf %97, %100 : vector<32x32xf32>
    %c1_76 = arith.constant 1 : index
    %c0_77 = arith.constant 0 : index
    %c0_78 = arith.constant 0 : index
    %102 = vector.load %arg19[%c1_76, %c0_77, %c0_78] : memref<2x32x128xbf16, #tpu.memory_space<vmem>>, vector<1x32x128xbf16>
    %103 = vector.shape_cast %102 : vector<1x32x128xbf16> to vector<32x128xbf16>
    %104 = arith.truncf %101 : vector<32x32xf32> to vector<32x32xbf16>
    %cst_79 = arith.constant dense<0.000000e+00> : vector<32x128xf32>
    %105 = tpu.matmul %104, %103, %cst_79 {dimension_numbers = #tpu.dot_dimension_numbers<[1], [0], [0], [1], [0, 0, 1, 1], [], []>} : vector<32x32xbf16>, vector<32x128xbf16>, vector<32x128xf32> -> vector<32x128xf32>
    %c1_80 = arith.constant 1 : index
    %c0_81 = arith.constant 0 : index
    %c0_82 = arith.constant 0 : index
    %106 = vector.load %arg20[%c1_80, %c0_81, %c0_82] : memref<2x1x128xf32, #tpu.memory_space<vmem>>, vector<1x1x128xf32>
    %107 = vector.shape_cast %106 : vector<1x1x128xf32> to vector<1x128xf32>
    %108 = vector.broadcast %107 : vector<1x128xf32> to vector<32x128xf32>
    %109 = arith.addf %105, %108 : vector<32x128xf32>
    %c1_83 = arith.constant 1 : index
    %c0_84 = arith.constant 0 : index
    %c0_85 = arith.constant 0 : index
    %110 = vector.load %arg21[%c1_83, %c0_84, %c0_85] : memref<2x32x128xf32, #tpu.memory_space<vmem>>, vector<1x32x128xf32>
    %111 = vector.shape_cast %110 : vector<1x32x128xf32> to vector<32x128xf32>
    %112 = vector.shape_cast %109 : vector<32x128xf32> to vector<1x32x128xf32>
    tpu.vector_store %arg21[%c1_83, %c0_84, %c0_85], %112 {strides = array<i32>} : memref<2x32x128xf32, #tpu.memory_space<vmem>>, vector<1x32x128xf32>,
    return
  }
}

</mosaic_0001>

<bundles_post_ra>
// kernel: squeeze.4
= control target key start
LH: loop header
LB: loop body
LE: loop exit
PB: predicated region body
PF: predicated region fallthrough
CT: control target
= control target key end

     0   :  { %vm3_vm0 = vcmask 130048   ;;  %s343_s0 = inlined_call_operand.vmem [shape: f32[1,32,24], index: 0, kind: input, shape index: {}]   ;;  %s344_s1 = inlined_call_operand.vmem [shape: f32[2,16,8,3], index: 1, kind: output, shape index: {}]  }
   0x1   :  { %v20_v0 = vld [vmem:[%s343_s0] sm:$0xff]   ;;  %v214_v1 = vld [vmem:[%s343_s0 + $0x10] sm:$0xff]   ;;  %v213_v2 = vld [vmem:[%s343_s0 + $0x8] sm:$0xff]   ;;  %s239_s0 = smov 112  }
   0x2   :  { %21 = vrot.lane.b32.xlu0 %v20_v0, %s239_s0  ;;  %39 = vrot.lane.b32.xlu1 %v214_v1, %s239_s0  ;;  %4 = vst.msk [vmem:[#allocation0] ss:$8 sm:$0xf] %vm3_vm0, %v20_v0   ;;  %5 = vst.msk [vmem:[#allocation0] ss:$8 sm:$0xf0] %vm3_vm0, %v20_v0  }
   0x3   :  { %17 = vst.msk [vmem:[#allocation0 + $0x80] ss:$8 sm:$0xf] %vm3_vm0, %v214_v1   ;;  %19 = vst.msk [vmem:[#allocation0 + $0x80] ss:$8 sm:$0xf0] %vm3_vm0, %v214_v1  }
   0x4   :  { %10 = vst.msk [vmem:[#allocation0 + $0x40] ss:$8 sm:$0xf] %vm3_vm0, %v213_v2   ;;  %12 = vst.msk [vmem:[#allocation0 + $0x40] ss:$8 sm:$0xf0] %vm3_vm0, %v213_v2  }
   0x6   :  { %30 = vrot.lane.b32.xlu0 %v213_v2, %s239_s0 }
  0x74   :  { %v22_v3 = vpop.permute.xlu0 %21   ;;  %v40_v4 = vpop.permute.xlu1 %39  }
  0x75   :  { %25 = vst.msk [vmem:[#allocation0 + $0x1] ss:$8 sm:$0xf] %vm3_vm0, %v22_v3   ;;  %27 = vst.msk [vmem:[#allocation0 + $0x1] ss:$8 sm:$0xf0] %vm3_vm0, %v22_v3  }
  0x76   :  { %43 = vst.msk [vmem:[#allocation0 + $0x81] ss:$8 sm:$0xf] %vm3_vm0, %v40_v4   ;;  %45 = vst.msk [vmem:[#allocation0 + $0x81] ss:$8 sm:$0xf0] %vm3_vm0, %v40_v4  }
  0x78   :  { %v31_v5 = vpop.permute.xlu0 %30  }
  0x79   :  { %34 = vst.msk [vmem:[#allocation0 + $0x41] ss:$8 sm:$0xf] %vm3_vm0, %v31_v5   ;;  %36 = vst.msk [vmem:[#allocation0 + $0x41] ss:$8 sm:$0xf0] %vm3_vm0, %v31_v5  }
  0x7c   :  { %v49_v6 = vld [vmem:[#allocation0] sm:$0x3]  ;;  %v53_v7 = vld [vmem:[#allocation0 + $0x8] sm:$0x3]  ;;  %v58_v8 = vld [vmem:[#allocation0 + $0x10] sm:$0x3] }
  0x7d   :  { %51 = vst [vmem:[%s344_s1] sm:$0x3] %v49_v6  ;;  %215 = vst [vmem:[%s344_s1 + $0x2] sm:$0x3] %v53_v7  ;;  %v64_v9 = vld [vmem:[#allocation0 + $0x18] sm:$0x3] }
  0x7e   :  { %216 = vst [vmem:[%s344_s1 + $0x4] sm:$0x3] %v58_v8  ;;  %v70_v10 = vld [vmem:[#allocation0 + $0x20] sm:$0x3]  ;;  %v76_v11 = vld [vmem:[#allocation0 + $0x28] sm:$0x3] }
  0x7f   :  { %217 = vst [vmem:[%s344_s1 + $0x6] sm:$0x3] %v64_v9  ;;  %218 = vst [vmem:[%s344_s1 + $0x8] sm:$0x3] %v70_v10  ;;  %v82_v12 = vld [vmem:[#allocation0 + $0x30] sm:$0x3] }
  0x80   :  { %219 = vst [vmem:[%s344_s1 + $0xa] sm:$0x3] %v76_v11  ;;  %v88_v13 = vld [vmem:[#allocation0 + $0x38] sm:$0x3]  ;;  %v142_v14 = vld [vmem:[#allocation0 + $0x80] sm:$0x3] }
  0x81   :  { %220 = vst [vmem:[%s344_s1 + $0xc] sm:$0x3] %v82_v12  ;;  %221 = vst [vmem:[%s344_s1 + $0xe] sm:$0x3] %v88_v13  ;;  %v148_v15 = vld [vmem:[#allocation0 + $0x88] sm:$0x3] }
  0x82   :  { %230 = vst [vmem:[%s344_s1 + $0x20] sm:$0x3] %v142_v14  ;;  %v154_v16 = vld [vmem:[#allocation0 + $0x90] sm:$0x3]  ;;  %v160_v17 = vld [vmem:[#allocation0 + $0x98] sm:$0x3] }
  0x83   :  { %231 = vst [vmem:[%s344_s1 + $0x22] sm:$0x3] %v148_v15  ;;  %232 = vst [vmem:[%s344_s1 + $0x24] sm:$0x3] %v154_v16  ;;  %v166_v18 = vld [vmem:[#allocation0 + $0xa0] sm:$0x3] }
  0x84   :  { %233 = vst [vmem:[%s344_s1 + $0x26] sm:$0x3] %v160_v17  ;;  %v172_v19 = vld [vmem:[#allocation0 + $0xa8] sm:$0x3]  ;;  %v178_v20 = vld [vmem:[#allocation0 + $0xb0] sm:$0x3] }
  0x85   :  { %234 = vst [vmem:[%s344_s1 + $0x28] sm:$0x3] %v166_v18  ;;  %235 = vst [vmem:[%s344_s1 + $0x2a] sm:$0x3] %v172_v19  ;;  %v184_v21 = vld [vmem:[#allocation0 + $0xb8] sm:$0x3] }
  0x86   :  { %236 = vst [vmem:[%s344_s1 + $0x2c] sm:$0x3] %v178_v20  ;;  %v94_v22 = vld [vmem:[#allocation0 + $0x40] sm:$0x3]  ;;  %v100_v23 = vld [vmem:[#allocation0 + $0x48] sm:$0x3] }
  0x87   :  { %237 = vst [vmem:[%s344_s1 + $0x2e] sm:$0x3] %v184_v21  ;;  %222 = vst [vmem:[%s344_s1 + $0x10] sm:$0x3] %v94_v22  ;;  %v106_v24 = vld [vmem:[#allocation0 + $0x50] sm:$0x3] }
  0x88   :  { %223 = vst [vmem:[%s344_s1 + $0x12] sm:$0x3] %v100_v23  ;;  %v112_v25 = vld [vmem:[#allocation0 + $0x58] sm:$0x3]  ;;  %v118_v26 = vld [vmem:[#allocation0 + $0x60] sm:$0x3] }
  0x89   :  { %224 = vst [vmem:[%s344_s1 + $0x14] sm:$0x3] %v106_v24  ;;  %225 = vst [vmem:[%s344_s1 + $0x16] sm:$0x3] %v112_v25  ;;  %v124_v27 = vld [vmem:[#allocation0 + $0x68] sm:$0x3] }
  0x8a   :  { %226 = vst [vmem:[%s344_s1 + $0x18] sm:$0x3] %v118_v26  ;;  %v130_v28 = vld [vmem:[#allocation0 + $0x70] sm:$0x3]  ;;  %v136_v29 = vld [vmem:[#allocation0 + $0x78] sm:$0x3] }
  0x8b   :  { %227 = vst [vmem:[%s344_s1 + $0x1a] sm:$0x3] %v124_v27  ;;  %228 = vst [vmem:[%s344_s1 + $0x1c] sm:$0x3] %v130_v28 }
  0x8c   :  { %229 = vst [vmem:[%s344_s1 + $0x1e] sm:$0x3] %v136_v29 }

// kernel: e2e_perception_forward.1
= control target key start
LH: loop header
LB: loop body
LE: loop exit
PB: predicated region body
PF: predicated region fallthrough
CT: control target
= control target key end

     0   :  { %s2170_s0 = inlined_call_operand.vmem [shape: f32[2,40], index: 0, kind: input, shape index: {}]   ;;  %s2171_s1 = inlined_call_operand.vmem [shape: f32[2,24], index: 1, kind: input, shape index: {}]   ;;  %s2172_s2 = inlined_call_operand.vmem [shape: f32[16,32], index: 2, kind: input, shape index: {}]   ;;  %s2173_s3 = inlined_call_operand.vmem [shape: bf16[40,32], index: 3, kind: input, shape index: {}]   ;;  %s2174_s4 = inlined_call_operand.vmem [shape: f32[1,32], index: 4, kind: input, shape index: {}]   ;;  %s2175_s5 = inlined_call_operand.vmem [shape: bf16[32,32], index: 5, kind: input, shape index: {}]   ;;  %s2176_s6 = inlined_call_operand.hbm [shape: f32[1,32], index: 6, kind: input, shape index: {}]   ;;  %s2177_s7 = inlined_call_operand.hbm [shape: bf16[24,32], index: 7, kind: input, shape index: {}]   ;;  %s2178_s8 = inlined_call_operand.hbm [shape: f32[1,32], index: 8, kind: input, shape index: {}]   ;;  %s2179_s9 = inlined_call_operand.vmem [shape: bf16[32,32], index: 9, kind: input, shape index: {}]   ;;  %s2180_s10 = inlined_call_operand.hbm [shape: f32[1,32], index: 10, kind: input, shape index: {}]   ;;  %s2181_s11 = inlined_call_operand.hbm [shape: bf16[32,32], index: 11, kind: input, shape index: {}]   ;;  %s2182_s12 = inlined_call_operand.hbm [shape: f32[1,32], index: 12, kind: input, shape index: {}]   ;;  %s2183_s13 = inlined_call_operand.hbm [shape: bf16[32,32], index: 13, kind: input, shape index: {}]   ;;  %s2184_s14 = inlined_call_operand.hbm [shape: f32[1,32], index: 14, kind: input, shape index: {}]   ;;  %s2185_s15 = inlined_call_operand.vmem [shape: bf16[2,32,32], index: 15, kind: input, shape index: {}]   ;;  %s2186_s16 = inlined_call_operand.hbm [shape: f32[2,1,32], index: 16, kind: input, shape index: {}]   ;;  %s2187_s17 = inlined_call_operand.hbm [shape: bf16[2,32,32], index: 17, kind: input, shape index: {}]   ;;  %s2188_s18 = inlined_call_operand.hbm [shape: f32[2,1,32], index: 18, kind: input, shape index: {}]   ;;  %s2189_s19 = inlined_call_operand.hbm [shape: bf16[2,32,128], index: 19, kind: input, shape index: {}]   ;;  %s2190_s20 = inlined_call_operand.hbm [shape: f32[2,1,128], index: 20, kind: input, shape index: {}]   ;;  %s2191_s21 = inlined_call_operand.vmem [shape: f32[2,32,128], index: 21, kind: output, shape index: {}]  }
   0x1   :  { %2196 = sst [smem:[#allocation29_spill]] %s2170_s0 }
   0x2   :  { %2197 = sst [smem:[#allocation30_spill]] %s2171_s1 }
   0x3   :  { %2198 = sst [smem:[#allocation31_spill]] %s2172_s2 }
   0x4   :  { %2199 = sst [smem:[#allocation32_spill]] %s2173_s3 }
   0x5   :  { %2200 = sst [smem:[#allocation33_spill]] %s2174_s4 }
   0x6   :  { %2201 = sst [smem:[#allocation34_spill]] %s2175_s5 }
   0x7   :  { %2202 = sst [smem:[#allocation35_spill]] %s2191_s21 }
   0x8   :  { %26 = vsyncpa [#allocation3], 0 }
   0x9   :  { %27 = vsyncpa [#allocation5], 0 }
   0xa   :  { %28 = vsyncpa [#allocation8], 0 }
   0xb   :  { %29 = vsyncpa [#allocation11], 0 }
   0xc   :  { %30 = vsyncpa [#allocation14], 0 }
   0xd   :  { %31 = vsyncpa [#allocation17], 0 }
   0xe   :  { %32 = vsyncpa [#allocation20], 0  ;;  %s1746_s2 = smov [#allocation4]   ;;  %s1446_s3 = scalar_lea.hbm %s2177_s7, 192 }
   0xf   :  { %s60_s25 = sshll.u32 %s1746_s2, 4  ;;  %p1447_p0 = scmp.ne.s32.totalorder %s2177_s7, %s1446_s3  ;;  %s61_s25 = int_to_ptr.vmem [resolvable:$true] %s60_s25 }
  0x10   :  { %p1450_p1 = scmp.lt.u32.totalorder %s1446_s3, %s2177_s7 }
  0x12   :  { %p1452_p2 = pnand %p1450_p1, %p1447_p0 }
  0x14   :  { %1455 = shalt.err (!%p1452_p2)
}
  0x15   :  { %s1456_s30 = scalar_lea.vmem %s61_s25, 192  ;;  %p1461_p4 = scmp.lt.s32.totalorder %s61_s25, %s61_s25 }
  0x16   :  { %p1457_p3 = scmp.ne.s32.totalorder %s61_s25, %s1456_s30  ;;  %p1462_p5 = scmp.lt.s32.totalorder %s1456_s30, %s1456_s30 }
  0x18   :  { %p1463_p6 = por %p1462_p5, %p1461_p4 }
  0x1a   :  { %p1464_p7 = pnand %p1463_p6, %p1457_p3 }
  0x1c   :  { %1467 = shalt.err (!%p1464_p7)
}
  0x1d   :  { %s1747_s5 = smov 64   ;;  %s1748_s22 = smov 4  }
  0x1e   :  { %66 = dma.hbm_to_vmem [thread:$0]  %s2177_s7, 192, %s61_s25, [#allocation5], %s1747_s5, %s1747_s5, %s1748_s22  }
  0x1f   :  { %s1749_s24 = smov [#allocation7]   ;;  %s1750_s26 = smov [#allocation10]  }
  0x20   :  { %s85_s2 = sshll.u32 %s1749_s24, 4  ;;  %s107_s27 = sshll.u32 %s1750_s26, 4  ;;  %s86_s2 = int_to_ptr.vmem [resolvable:$true] %s85_s2  ;;  %s108_s27 = int_to_ptr.vmem [resolvable:$true] %s107_s27 }
  0x21   :  { %s1468_s29 = scalar_lea.hbm %s2180_s10, 16 }
  0x22   :  { %p1469_p8 = scmp.ne.s32.totalorder %s2180_s10, %s1468_s29  ;;  %p1472_p9 = scmp.lt.u32.totalorder %s1468_s29, %s2180_s10 }
  0x24   :  { %p1474_p10 = pnand %p1472_p9, %p1469_p8 }
  0x26   :  { %1477 = shalt.err (!%p1474_p10)
}
  0x27   :  { %s1478_s7 = scalar_lea.vmem %s86_s2, 16  ;;  %s1482_s25 = scalar_lea.vmem %s86_s2, 32 }
  0x28   :  { %p1479_p11 = scmp.ne.s32.totalorder %s86_s2, %s1478_s7  ;;  %p1483_p12 = scmp.lt.s32.totalorder %s86_s2, %s86_s2 }
  0x29   :  { %p1484_p13 = scmp.lt.s32.totalorder %s1482_s25, %s1478_s7 }
  0x2b   :  { %p1485_p0 = por %p1484_p13, %p1483_p12 }
  0x2d   :  { %p1486_p1 = pnand %p1485_p0, %p1479_p11 }
  0x2f   :  { %1489 = shalt.err (!%p1486_p1)
}
  0x30   :  { %88 = dma.hbm_to_vmem [thread:$0]  %s2180_s10, 16, %s86_s2, [#allocation8]  }
  0x31   :  { %s1490_s21 = scalar_lea.hbm %s2182_s12, 16 }
  0x32   :  { %p1491_p2 = scmp.ne.s32.totalorder %s2182_s12, %s1490_s21  ;;  %p1494_p3 = scmp.lt.u32.totalorder %s1490_s21, %s2182_s12 }
  0x34   :  { %p1496_p4 = pnand %p1494_p3, %p1491_p2 }
  0x36   :  { %1499 = shalt.err (!%p1496_p4)
}
  0x37   :  { %s1500_s4 = scalar_lea.vmem %s108_s27, 16  ;;  %s1504_s30 = scalar_lea.vmem %s108_s27, 32 }
  0x38   :  { %p1501_p5 = scmp.ne.s32.totalorder %s108_s27, %s1500_s4  ;;  %p1505_p6 = scmp.lt.s32.totalorder %s108_s27, %s108_s27 }
  0x39   :  { %p1506_p7 = scmp.lt.s32.totalorder %s1504_s30, %s1500_s4 }
  0x3b   :  { %p1507_p8 = por %p1506_p7, %p1505_p6 }
  0x3d   :  { %p1508_p9 = pnand %p1507_p8, %p1501_p5 }
  0x3f   :  { %1511 = shalt.err (!%p1508_p9)
}
  0x40   :  { %110 = dma.hbm_to_vmem [thread:$0]  %s2182_s12, 16, %s108_s27, [#allocation11]  }
  0x41   :  { %s1751_s7 = smov [#allocation13]   ;;  %s1752_s23 = smov [#allocation16]  }
  0x42   :  { %s129_s25 = sshll.u32 %s1751_s7, 4  ;;  %s152_s1 = sshll.u32 %s1752_s23, 4  ;;  %s130_s25 = int_to_ptr.vmem [resolvable:$true] %s129_s25  ;;  %s153_s1 = int_to_ptr.vmem [resolvable:$true] %s152_s1 }
  0x43   :  { %s1512_s21 = scalar_lea.hbm %s2184_s14, 16 }
  0x44   :  { %p1513_p10 = scmp.ne.s32.totalorder %s2184_s14, %s1512_s21  ;;  %p1516_p11 = scmp.lt.u32.totalorder %s1512_s21, %s2184_s14 }
  0x46   :  { %p1518_p12 = pnand %p1516_p11, %p1513_p10 }
  0x48   :  { %1521 = shalt.err (!%p1518_p12)
}
  0x49   :  { %s1522_s12 = scalar_lea.vmem %s130_s25, 16  ;;  %s1526_s27 = scalar_lea.vmem %s130_s25, 32 }
  0x4a   :  { %p1523_p13 = scmp.ne.s32.totalorder %s130_s25, %s1522_s12  ;;  %p1527_p0 = scmp.lt.s32.totalorder %s130_s25, %s130_s25 }
  0x4b   :  { %p1528_p1 = scmp.lt.s32.totalorder %s1526_s27, %s1522_s12 }
  0x4d   :  { %p1529_p2 = por %p1528_p1, %p1527_p0 }
  0x4f   :  { %p1530_p3 = pnand %p1529_p2, %p1523_p13 }
  0x51   :  { %1533 = shalt.err (!%p1530_p3)
}
  0x52   :  { %132 = dma.hbm_to_vmem [thread:$0]  %s2184_s14, 16, %s130_s25, [#allocation14]  }
  0x53   :  { %s1534_s7 = scalar_lea.hbm %s2187_s17, 512 }
  0x54   :  { %p1535_p4 = scmp.ne.s32.totalorder %s2187_s17, %s1534_s7  ;;  %p1538_p5 = scmp.lt.u32.totalorder %s1534_s7, %s2187_s17 }
  0x56   :  { %p1540_p6 = pnand %p1538_p5, %p1535_p4 }
  0x58   :  { %1543 = shalt.err (!%p1540_p6)
}
  0x59   :  { %s1544_s3 = scalar_lea.vmem %s153_s1, 512  ;;  %p1549_p8 = scmp.lt.s32.totalorder %s153_s1, %s153_s1 }
  0x5a   :  { %p1545_p7 = scmp.ne.s32.totalorder %s153_s1, %s1544_s3  ;;  %p1550_p9 = scmp.lt.s32.totalorder %s1544_s3, %s1544_s3 }
  0x5c   :  { %p1551_p10 = por %p1550_p9, %p1549_p8 }
  0x5e   :  { %p1552_p11 = pnand %p1551_p10, %p1545_p7 }
  0x60   :  { %1555 = shalt.err (!%p1552_p11)
}
  0x61   :  { %158 = dma.hbm_to_vmem [thread:$0]  %s2187_s17, 512, %s153_s1, [#allocation17], %s1747_s5, %s1747_s5, %s1748_s22  }
  0x62   :  { %s1753_s28 = smov [#allocation19]   ;;  %s1754_s0 = smov [#allocation2]  }
  0x63   :  { %s176_s29 = sshll.u32 %s1753_s28, 4  ;;  %s51_s12 = sshll.u32 %s1754_s0, 4  ;;  %s177_s29 = int_to_ptr.vmem [resolvable:$true] %s176_s29  ;;  %s52_s12 = int_to_ptr.vmem [resolvable:$true] %s51_s12 }
  0x64   :  { %s1556_s30 = scalar_lea.hbm %s2189_s19, 512 }
  0x65   :  { %p1557_p12 = scmp.ne.s32.totalorder %s2189_s19, %s1556_s30  ;;  %p1560_p13 = scmp.lt.u32.totalorder %s1556_s30, %s2189_s19 }
  0x67   :  { %p1562_p0 = pnand %p1560_p13, %p1557_p12 }
  0x69   :  { %1565 = shalt.err (!%p1562_p0)
}
  0x6a   :  { %s1566_s17 = scalar_lea.vmem %s177_s29, 512  ;;  %p1571_p2 = scmp.lt.s32.totalorder %s177_s29, %s177_s29 }
  0x6b   :  { %p1567_p1 = scmp.ne.s32.totalorder %s177_s29, %s1566_s17  ;;  %p1572_p3 = scmp.lt.s32.totalorder %s1566_s17, %s1566_s17 }
  0x6d   :  { %p1573_p4 = por %p1572_p3, %p1571_p2 }
  0x6f   :  { %p1574_p5 = pnand %p1573_p4, %p1567_p1 }
  0x71   :  { %1577 = shalt.err (!%p1574_p5)
}
  0x72   :  { %182 = dma.hbm_to_vmem [thread:$0]  %s2189_s19, 512, %s177_s29, [#allocation20], %s1747_s5, %s1747_s5, %s1748_s22  }
  0x73   :  { %s1578_s3 = scalar_lea.hbm %s2176_s6, 16 }
  0x74   :  { %p1579_p6 = scmp.ne.s32.totalorder %s2176_s6, %s1578_s3  ;;  %p1582_p7 = scmp.lt.u32.totalorder %s1578_s3, %s2176_s6 }
  0x76   :  { %p1584_p8 = pnand %p1582_p7, %p1579_p6 }
  0x78   :  { %1587 = shalt.err (!%p1584_p8)
}
  0x79   :  { %s1588_s27 = scalar_lea.vmem %s52_s12, 16  ;;  %s1592_s4 = scalar_lea.vmem %s52_s12, 32 }
  0x7a   :  { %p1589_p9 = scmp.ne.s32.totalorder %s52_s12, %s1588_s27  ;;  %p1593_p10 = scmp.lt.s32.totalorder %s52_s12, %s52_s12 }
  0x7b   :  { %p1594_p11 = scmp.lt.s32.totalorder %s1592_s4, %s1588_s27 }
  0x7d   :  { %p1595_p12 = por %p1594_p11, %p1593_p10 }
  0x7f   :  { %p1596_p13 = pnand %p1595_p12, %p1589_p9 }
  0x81   :  { %1599 = shalt.err (!%p1596_p13)
}
  0x82   :  { %54 = dma.hbm_to_vmem [thread:$0]  %s2176_s6, 16, %s52_s12, [#allocation3]  }
  0x83   :  { %s1755_s30 = smov [#allocation6]   ;;  %s1756_s2 = smov [#allocation9]  }
  0x84   :  { %s73_s10 = sshll.u32 %s1755_s30, 4  ;;  %s94_s7 = sshll.u32 %s1756_s2, 4  ;;  %s74_s10 = int_to_ptr.vmem [resolvable:$true] %s73_s10  ;;  %s95_s7 = int_to_ptr.vmem [resolvable:$true] %s94_s7 }
  0x85   :  { %s1600_s1 = scalar_lea.hbm %s2178_s8, 16 }
  0x86   :  { %p1601_p0 = scmp.ne.s32.totalorder %s2178_s8, %s1600_s1  ;;  %p1604_p1 = scmp.lt.u32.totalorder %s1600_s1, %s2178_s8 }
  0x88   :  { %p1606_p2 = pnand %p1604_p1, %p1601_p0 }
  0x8a   :  { %1609 = shalt.err (!%p1606_p2)
}
  0x8b   :  { %s1610_s6 = scalar_lea.vmem %s74_s10, 16  ;;  %s1614_s12 = scalar_lea.vmem %s74_s10, 32 }
  0x8c   :  { %p1611_p3 = scmp.ne.s32.totalorder %s74_s10, %s1610_s6  ;;  %p1615_p4 = scmp.lt.s32.totalorder %s74_s10, %s74_s10 }
  0x8d   :  { %p1616_p5 = scmp.lt.s32.totalorder %s1614_s12, %s1610_s6 }
  0x8f   :  { %p1617_p6 = por %p1616_p5, %p1615_p4 }
  0x91   :  { %p1618_p7 = pnand %p1617_p6, %p1611_p3 }
  0x93   :  { %1621 = shalt.err (!%p1618_p7)
}
  0x94   :  { %76 = dma.hbm_to_vmem [thread:$0]  %s2178_s8, 16, %s74_s10, [#allocation5]  }
  0x95   :  { %s1622_s27 = scalar_lea.hbm %s2181_s11, 256 }
  0x96   :  { %p1623_p8 = scmp.ne.s32.totalorder %s2181_s11, %s1622_s27  ;;  %p1626_p9 = scmp.lt.u32.totalorder %s1622_s27, %s2181_s11 }
  0x98   :  { %p1628_p10 = pnand %p1626_p9, %p1623_p8 }
  0x9a   :  { %1631 = shalt.err (!%p1628_p10)
}
  0x9b   :  { %s1632_s2 = scalar_lea.vmem %s95_s7, 256  ;;  %p1637_p12 = scmp.lt.s32.totalorder %s95_s7, %s95_s7 }
  0x9c   :  { %p1633_p11 = scmp.ne.s32.totalorder %s95_s7, %s1632_s2  ;;  %p1638_p13 = scmp.lt.s32.totalorder %s1632_s2, %s1632_s2 }
  0x9e   :  { %p1639_p0 = por %p1638_p13, %p1637_p12 }
  0xa0   :  { %p1640_p1 = pnand %p1639_p0, %p1633_p11 }
  0xa2   :  { %1643 = shalt.err (!%p1640_p1)
}
  0xa3   :  { %100 = dma.hbm_to_vmem [thread:$0]  %s2181_s11, 256, %s95_s7, [#allocation8], %s1747_s5, %s1747_s5, %s1748_s22  }
  0xa4   :  { %s1757_s23 = smov [#allocation12]   ;;  %s1758_s1 = smov [#allocation15]  }
  0xa5   :  { %s116_s17 = sshll.u32 %s1757_s23, 4  ;;  %s140_s24 = sshll.u32 %s1758_s1, 4  ;;  %s117_s17 = int_to_ptr.vmem [resolvable:$true] %s116_s17  ;;  %s141_s24 = int_to_ptr.vmem [resolvable:$true] %s140_s24 }
  0xa6   :  { %s1644_s3 = scalar_lea.hbm %s2183_s13, 256 }
  0xa7   :  { %p1645_p2 = scmp.ne.s32.totalorder %s2183_s13, %s1644_s3  ;;  %p1648_p3 = scmp.lt.u32.totalorder %s1644_s3, %s2183_s13 }
  0xa9   :  { %p1650_p4 = pnand %p1648_p3, %p1645_p2 }
  0xab   :  { %1653 = shalt.err (!%p1650_p4)
}
  0xac   :  { %s1654_s11 = scalar_lea.vmem %s117_s17, 256  ;;  %p1659_p6 = scmp.lt.s32.totalorder %s117_s17, %s117_s17 }
  0xad   :  { %p1655_p5 = scmp.ne.s32.totalorder %s117_s17, %s1654_s11  ;;  %p1660_p7 = scmp.lt.s32.totalorder %s1654_s11, %s1654_s11 }
  0xaf   :  { %p1661_p8 = por %p1660_p7, %p1659_p6 }
  0xb1   :  { %p1662_p9 = pnand %p1661_p8, %p1655_p5 }
  0xb3   :  { %1665 = shalt.err (!%p1662_p9)
}
  0xb4   :  { %122 = dma.hbm_to_vmem [thread:$0]  %s2183_s13, 256, %s117_s17, [#allocation11], %s1747_s5, %s1747_s5, %s1748_s22  }
  0xb5   :  { %s1666_s4 = scalar_lea.hbm %s2186_s16, 32 }
  0xb6   :  { %p1667_p10 = scmp.ne.s32.totalorder %s2186_s16, %s1666_s4  ;;  %p1670_p11 = scmp.lt.u32.totalorder %s1666_s4, %s2186_s16 }
  0xb8   :  { %p1672_p12 = pnand %p1670_p11, %p1667_p10 }
  0xba   :  { %1675 = shalt.err (!%p1672_p12)
}
  0xbb   :  { %s1676_s8 = scalar_lea.vmem %s141_s24, 32  ;;  %p1681_p0 = scmp.lt.s32.totalorder %s141_s24, %s141_s24 }
  0xbc   :  { %p1677_p13 = scmp.ne.s32.totalorder %s141_s24, %s1676_s8  ;;  %p1682_p1 = scmp.lt.s32.totalorder %s1676_s8, %s1676_s8 }
  0xbe   :  { %p1683_p2 = por %p1682_p1, %p1681_p0 }
  0xc0   :  { %p1684_p3 = pnand %p1683_p2, %p1677_p13 }
  0xc2   :  { %1687 = shalt.err (!%p1684_p3)
}
  0xc3   :  { %s1759_s13 = smov 16   ;;  %s1760_s5 = smov 1  }
  0xc4   :  { %146 = dma.hbm_to_vmem [thread:$0]  %s2186_s16, 32, %s141_s24, [#allocation14], %s1759_s13, %s1759_s13, %s1760_s5  }
  0xc5   :  { %s1761_s23 = smov [#allocation18]   ;;  %s1762_s1 = smov [#allocation21]  }
  0xc6   :  { %s164_s17 = sshll.u32 %s1761_s23, 4  ;;  %s188_s26 = sshll.u32 %s1762_s1, 4  ;;  %s165_s17 = int_to_ptr.vmem [resolvable:$true] %s164_s17  ;;  %s189_s26 = int_to_ptr.vmem [resolvable:$true] %s188_s26 }
  0xc7   :  { %s1688_s6 = scalar_lea.hbm %s2188_s18, 32 }
  0xc8   :  { %p1689_p4 = scmp.ne.s32.totalorder %s2188_s18, %s1688_s6  ;;  %p1692_p5 = scmp.lt.u32.totalorder %s1688_s6, %s2188_s18 }
  0xca   :  { %p1694_p6 = pnand %p1692_p5, %p1689_p4 }
  0xcc   :  { %1697 = shalt.err (!%p1694_p6)
}
  0xcd   :  { %s1698_s16 = scalar_lea.vmem %s165_s17, 32  ;;  %p1703_p8 = scmp.lt.s32.totalorder %s165_s17, %s165_s17 }
  0xce   :  { %p1699_p7 = scmp.ne.s32.totalorder %s165_s17, %s1698_s16  ;;  %p1704_p9 = scmp.lt.s32.totalorder %s1698_s16, %s1698_s16 }
  0xd0   :  { %p1705_p10 = por %p1704_p9, %p1703_p8 }
  0xd2   :  { %p1706_p11 = pnand %p1705_p10, %p1699_p7 }
  0xd4   :  { %1709 = shalt.err (!%p1706_p11)
}
  0xd5   :  { %170 = dma.hbm_to_vmem [thread:$0]  %s2188_s18, 32, %s165_s17, [#allocation17], %s1759_s13, %s1759_s13, %s1760_s5  }
  0xd6   :  { %s1710_s27 = scalar_lea.hbm %s2190_s20, 32 }
  0xd7   :  { %p1711_p12 = scmp.ne.s32.totalorder %s2190_s20, %s1710_s27  ;;  %p1714_p13 = scmp.lt.u32.totalorder %s1710_s27, %s2190_s20 }
  0xd9   :  { %p1716_p0 = pnand %p1714_p13, %p1711_p12 }
  0xdb   :  { %1719 = shalt.err (!%p1716_p0)
}
  0xdc   :  { %s1720_s2 = scalar_lea.vmem %s189_s26, 32  ;;  %p1725_p2 = scmp.lt.s32.totalorder %s189_s26, %s189_s26 }
  0xdd   :  { %p1721_p1 = scmp.ne.s32.totalorder %s189_s26, %s1720_s2  ;;  %p1726_p3 = scmp.lt.s32.totalorder %s1720_s2, %s1720_s2 }
  0xdf   :  { %p1727_p4 = por %p1726_p3, %p1725_p2 }
  0xe1   :  { %p1728_p5 = pnand %p1727_p4, %p1721_p1 }
  0xe3   :  { %1731 = shalt.err (!%p1728_p5)
}
  0xe4   :  { %194 = dma.hbm_to_vmem [thread:$0]  %s2190_s20, 32, %s189_s26, [#allocation20], %s1759_s13, %s1759_s13, %s1760_s5  }
  0xe5   :  { %1732 = dma.done.wait [#allocation3], 16  }
  0xe6   :  { %1733 = vsyncadd [#allocation3], 4294967280 }
  0xe7   :  { %1734 = dma.done.wait [#allocation5], 208  }
  0xe8   :  { %1735 = vsyncadd [#allocation5], 4294967088 }
  0xe9   :  { %1736 = dma.done.wait [#allocation8], 272  }
  0xea   :  { %1737 = vsyncadd [#allocation8], 4294967024 }
  0xeb   :  { %1738 = dma.done.wait [#allocation11], 272  }
  0xec   :  { %1739 = vsyncadd [#allocation11], 4294967024 }
  0xed   :  { %1740 = dma.done.wait [#allocation14], 48  }
  0xee   :  { %1741 = vsyncadd [#allocation14], 4294967248 }
  0xef   :  { %1742 = dma.done.wait [#allocation17], 544  }
  0xf0   :  { %1743 = vsyncadd [#allocation17], 4294966752 }
  0xf1   :  { %1744 = dma.done.wait [#allocation20], 544  }
  0xf2   :  { %1745 = vsyncadd [#allocation20], 4294966752  ;;  %v1763_v0 = vmov 0.0   ;;  %vm1764_vm0 = vmmov 0   ;;  %s2203_s5 = sld [smem:[#allocation32_spill]]  ;;  %vm273_vm1 = vcmask 1043456   ;;  %v658_v55 = vlaneseq }
  0xf3   :  { %1298 = vmatprep.subr.bf16.mxu0 %v1763_v0  ;;  %1304 = vmatprep.mubr.msk.bf16.mxu0 %vm1764_vm0, %v1763_v0  ;;  %s2204_s21 = sld [smem:[#allocation34_spill]]  ;;  %s2205_s12 = sld [smem:[#allocation29_spill]]  ;;  %vm269_vm2 = vcmask 326656   ;;  %v1425_v8 = vld [vmem:[#allocation9] sm:$0xff]   ;;  %v1427_v10 = vld [vmem:[#allocation9 + $0x8] sm:$0xff]   ;;  %vm337_vm3 = vcmask 261120  }
  0xf4   :  { %1308 = vmatprep.subr.bf16.mxu1 %v1763_v0  ;;  %1312 = vmatprep.mubr.msk.bf16.mxu1 %vm1764_vm0, %v1763_v0  ;;  %s2206_s24 = sld [smem:[#allocation31_spill]]  ;;  %v1430_v14 = vld [vmem:[#allocation12] sm:$0xff]   ;;  %v1432_v15 = vld [vmem:[#allocation12 + $0x8] sm:$0xff]   ;;  %s2207_s4 = sld [smem:[#allocation33_spill]]  ;;  %vm407_vm4 = vcmask 195584   ;;  %v659_v58 = vshrl.u32 %v658_v55, 7 }
  0xf5   :  { %v1428_v23 = vld [vmem:[#allocation4] sm:$0xff]   ;;  %v1429_v25 = vld [vmem:[#allocation4 + $0x8] ss:$0 sps:$4 sm:$0xff]   ;;  %s2208_s30 = sld [smem:[#allocation30_spill]]  ;;  %v1201_v41 = vld [vmem:[#allocation6] ss:$0 sm:$0xff] }
  0xf6   :  { %v412_v27 = vsel %vm273_vm1, %v1429_v25, 0  ;;  %v1431_v29 = vld [vmem:[%s2179_s9] sm:$0xff]   ;;  %v1433_v40 = vld [vmem:[%s2179_s9 + $0x8] sm:$0xff]   ;;  %v1205_v57 = vld [vmem:[#allocation7] ss:$0 sm:$0xff]  ;;  %v660_v60 = vsub.s32 0, %v659_v58 }
  0xf7   :  { %v1209_v30 = vld [vmem:[#allocation10] ss:$0 sm:$0xff]  ;;  %v1435_v54 = vld [vmem:[%s2185_s15 + $0x8] sm:$0xff]   ;;  %v1197_v56 = vld [vmem:[#allocation2] ss:$0 sm:$0xff]  ;;  %v666_v61 = vsub.s32 1, %v659_v58 }
  0xf8   :  { %v1421_v1 = vld [vmem:[%s2203_s5] sm:$0xff]   ;;  %v1422_v2 = vld [vmem:[%s2203_s5 + $0x8] sm:$0xff]   ;;  %v1423_v3 = vld [vmem:[%s2203_s5 + $0x10] ss:$0 sps:$4 sm:$0xff]   ;;  %v1396_v59 = vadd.f32 %v1205_v57, %v1197_v56 }
  0xf9   :  { %1299 = vmatpush3.bf16.msra.mxu0 %v1421_v1  ;;  %v1424_v4 = vld [vmem:[%s2204_s21] sm:$0xff]   ;;  %v275_v5 = vsel %vm273_vm1, %v1423_v3, 0  ;;  %v1426_v9 = vld [vmem:[%s2204_s21 + $0x8] sm:$0xff]   ;;  %v1213_v62 = vld [vmem:[#allocation13] ss:$0 sm:$0xff]  ;;  %s2209_s21 = sld [smem:[#allocation35_spill]] }
  0xfa   :  { %1300 = vmatprep.subr.bf16.mxu0 %v1763_v0  ;;  %v235_v6 = vld [vmem:[%s2205_s12] sm:$0x3]  ;;  %1309 = vmatpush3.bf16.msra.mxu1 %v1424_v4  ;;  %v518_v12 = vld [vmem:[%s2206_s24 + $0x8] sm:$0xff] }
  0xfb   :  { %1310 = vmatprep.subr.bf16.mxu1 %v1763_v0  ;;  %v247_v7 = vpack.c.bf16 %v235_v6, %v235_v6  ;;  %v517_v11 = vld [vmem:[%s2206_s24] sm:$0xff] }
  0xfc   :  { %v529_v13 = vpack.c.bf16 %v518_v12, %v517_v11  ;;  %v1192_v16 = vld [vmem:[%s2207_s4] ss:$0 sm:$0xff] }
  0xfd   :  { %1301 = vmatpush3.bf16.msra.mxu0 %v1422_v2  ;;  %v381_v26 = vld [vmem:[%s2208_s30] sm:$0x3] }
  0xfe   :  { %1302 = vmatprep.subr.bf16.mxu0 %v1763_v0  ;;  %1311 = vmatpush3.bf16.msra.mxu1 %v1426_v9  ;;  %v391_v28 = vpack.c.bf16 %v381_v26, %v381_v26  ;;  %v1434_v53 = vld [vmem:[%s2185_s15] sm:$0xff]  }
  0xff   :  { %1316 = vmatprep.subr.bf16.mxu1 %v1763_v0 }
 0x101   :  { %1303 = vmatpush3.bf16.msra.mxu0 %v275_v5 }
 0x102   :  { %1332 = vmatprep.subr.bf16.mxu0 %v1763_v0 }
 0x104   :  { %1305 = vmatmul.mubr.msk.bf16.vlgmr.msra.gmra.mrb[0].mxu0 %vm269_vm2, %v247_v7 }
 0x105   :  { %1336 = vmatprep.mubr.msk.bf16.mxu0 %vm1764_vm0, %v1763_v0  ;;  %1333 = vmatpush3.bf16.msra.mxu0 %v1425_v8 }
 0x106   :  { %1334 = vmatprep.subr.bf16.mxu0 %v1763_v0 }
 0x109   :  { %1335 = vmatpush3.bf16.msra.mxu0 %v1427_v10 }
 0x10a   :  { %1340 = vmatprep.subr.bf16.mxu0 %v1763_v0 }
 0x10c   :  { %1337 = vmatmul.mubr.msk.bf16.vlgmr.msra.gmra.mrb[4].mxu0 %vm337_vm3, %v529_v13 }
 0x10d   :  { %1344 = vmatprep.mubr.msk.bf16.mxu0 %vm1764_vm0, %v1763_v0  ;;  %1341 = vmatpush3.bf16.msra.mxu0 %v1430_v14  ;;  %v1436_v14 = vld [vmem:[#allocation16] sm:$0xff]  }
 0x10e   :  { %1342 = vmatprep.subr.bf16.mxu0 %v1763_v0 }
 0x111   :  { %1343 = vmatpush3.bf16.msra.mxu0 %v1432_v15  ;;  %v1437_v15 = vld [vmem:[#allocation16 + $0x8] sm:$0xff]  }
 0x112   :  { %1356 = vmatprep.subr.bf16.mxu0 %v1436_v14 }
 0x1d7   :  { %v311_v17 = vpop.f32.mrb[0].mxu0 }
 0x1d8   :  { %v312_v18 = vadd.f32 %v1192_v16, %v311_v17  ;;  %v1306_v19 = vpop.f32.mrb[1].mxu0  ;;  %v1217_v16 = vld [vmem:[#allocation15] ss:$0 sm:$0xff] }
 0x1d9   :  { %v314_v20 = vpop.f32.mrb[2].mxu0 }
 0x1da   :  { %v317_v21 = vmax.f32 %v312_v18, 0.0  ;;  %v1307_v22 = vpop.f32.mrb[3].mxu0 }
 0x1dc   :  { %v318_v24 = vpack.c.bf16 %v317_v21, %v317_v21 }
 0x1de   :  { %1313 = vmatmul.mubr.msk.bf16.vlgmr.msra.gmra.mrb[0].mxu1 %vm337_vm3, %v318_v24 }
 0x1df   :  { %1317 = vmatpush3.bf16.msra.mxu1 %v1428_v23  ;;  %1320 = vmatprep.mubr.msk.bf16.mxu1 %vm1764_vm0, %v1763_v0  ;;  %v585_v31 = vpop.f32.mrb[4].mxu0 }
 0x1e0   :  { %1318 = vmatprep.subr.bf16.mxu1 %v1763_v0  ;;  %v586_v32 = vadd.f32 %v1209_v30, %v585_v31  ;;  %v1338_v33 = vpop.f32.mrb[5].mxu0  ;;  %v1438_v31 = vld [vmem:[%s2185_s15 + $0x10] sm:$0xff]  }
 0x1e1   :  { %v588_v34 = vpop.f32.mrb[6].mxu0  ;;  %v1440_v33 = vld [vmem:[%s2185_s15 + $0x18] sm:$0xff]  }
 0x1e2   :  { %v592_v35 = vmax.f32 %v586_v32, 0.0  ;;  %v589_v36 = vadd.f32 %v1209_v30, %v588_v34  ;;  %v1339_v37 = vpop.f32.mrb[7].mxu0  ;;  %v1439_v32 = vld [vmem:[#allocation19] sm:$0xff]   ;;  %v1441_v34 = vld [vmem:[#allocation19 + $0x8] sm:$0xff]  }
 0x1e3   :  { %1319 = vmatpush3.bf16.msra.mxu1 %v412_v27 }
 0x1e4   :  { %1324 = vmatprep.subr.bf16.mxu1 %v1763_v0  ;;  %v593_v38 = vmax.f32 %v589_v36, 0.0 }
 0x1e6   :  { %1321 = vmatmul.mubr.msk.bf16.vlgmr.msra.gmra.mrb[4].mxu1 %vm407_vm4, %v391_v28  ;;  %v594_v39 = vpack.c.bf16 %v593_v38, %v592_v35 }
 0x1e7   :  { %1325 = vmatpush3.bf16.msra.mxu1 %v1431_v29  ;;  %1328 = vmatprep.mubr.msk.bf16.mxu1 %vm1764_vm0, %v1763_v0 }
 0x1e8   :  { %1326 = vmatprep.subr.bf16.mxu1 %v1763_v0  ;;  %1345 = vmatmul.mubr.msk.bf16.vlgmr.msra.gmra.mrb[8].mxu0 %vm337_vm3, %v594_v39 }
 0x1e9   :  { %1357 = vmatpush3.bf16.msra.mxu0 %v1436_v14 }
 0x1ea   :  { %1358 = vmatprep.subr.bf16.mxu0 %v1437_v15 }
 0x1eb   :  { %1327 = vmatpush3.bf16.msra.mxu1 %v1433_v40  ;;  %v1226_v40 = vld [vmem:[#allocation18] ss:$0 sm:$0xff] }
 0x1ec   :  { %1348 = vmatprep.subr.bf16.mxu1 %v1434_v53 }
 0x1ed   :  { %1359 = vmatpush3.bf16.msra.mxu0 %v1437_v15 }
 0x1ee   :  { %1372 = vmatprep.subr.bf16.mxu0 %v1438_v31 }
 0x2b9   :  { %v448_v42 = vpop.f32.mrb[4].mxu1 }
 0x2ba   :  { %v449_v43 = vadd.f32 %v1201_v41, %v448_v42  ;;  %v1322_v44 = vpop.f32.mrb[5].mxu1 }
 0x2bb   :  { %v451_v45 = vpop.f32.mrb[6].mxu1  ;;  %v650_v49 = vpop.f32.mrb[8].mxu0 }
 0x2bc   :  { %v454_v46 = vmax.f32 %v449_v43, 0.0  ;;  %v1323_v47 = vpop.f32.mrb[7].mxu1  ;;  %v1346_v50 = vpop.f32.mrb[9].mxu0  ;;  %v651_v3 = vadd.f32 %v1213_v62, %v650_v49 }
 0x2bd   :  { %v653_v51 = vpop.f32.mrb[10].mxu0  ;;  %v1442_v50 = vld [vmem:[#allocation16 + $0x10] sm:$0xff]  }
 0x2be   :  { %v455_v48 = vpack.c.bf16 %v454_v46, %v454_v46  ;;  %v1347_v52 = vpop.f32.mrb[11].mxu0  ;;  %v654_v4 = vadd.f32 %v1213_v62, %v653_v51  ;;  %v1443_v51 = vld [vmem:[#allocation16 + $0x18] sm:$0xff]  }
 0x2bf   :  { %v1227_v52 = vld [vmem:[#allocation21] ss:$0 sm:$0xff] }
 0x2c0   :  { %1329 = vmatmul.mubr.msk.bf16.vlgmr.msra.gmra.mrb[0].mxu1 %vm337_vm3, %v455_v48 }
 0x2c1   :  { %1349 = vmatpush3.bf16.msra.mxu1 %v1434_v53  ;;  %v1236_v53 = vld [vmem:[#allocation15 + $0x1] ss:$0 sm:$0xff] }
 0x2c2   :  { %1350 = vmatprep.subr.bf16.mxu1 %v1435_v54 }
 0x2c5   :  { %1351 = vmatpush3.bf16.msra.mxu1 %v1435_v54 }
 0x2c6   :  { %1364 = vmatprep.subr.bf16.mxu1 %v1439_v32 }
 0x393   :  { %v511_v63 = vpop.f32.mrb[0].mxu1 }
 0x394   :  { %v1397_v0 = vadd.f32 %v1396_v59, %v511_v63  ;;  %v1330_v1 = vpop.f32.mrb[1].mxu1 }
 0x395   :  { %v514_v2 = vpop.f32.mrb[2].mxu1 }
 0x396   :  { %v661_v5 = vrot.slane %v1397_v0, %v660_v60  ;;  %v667_v6 = vrot.slane %v1397_v0, %v666_v61  ;;  %v1331_v7 = vpop.f32.mrb[3].mxu1 }
 0x398   :  { %v662_v8 = vadd.f32 %v661_v5, %v651_v3  ;;  %v663_v9 = vadd.f32 %v661_v5, %v654_v4  ;;  %v668_v10 = vadd.f32 %v667_v6, %v651_v3  ;;  %v669_v11 = vadd.f32 %v667_v6, %v654_v4 }
 0x39a   :  { %v674_v12 = vpack.c.bf16 %v663_v9, %v662_v8  ;;  %v675_v13 = vpack.c.bf16 %v669_v11, %v668_v10 }
 0x39c   :  { %1352 = vmatprep.mubr.msk.bf16.mxu1 %vm337_vm3, %v674_v12  ;;  %v1444_v12 = vld [vmem:[#allocation19 + $0x10] sm:$0xff]  }
 0x39d   :  { %1353 = vmatmul.mubr.msk.bf16.vlgmr.msra.gmra.mrb[8].mxu1 %vm337_vm3, %v675_v13  ;;  %v1445_v13 = vld [vmem:[#allocation19 + $0x18] sm:$0xff]  }
 0x39e   :  { %1365 = vmatpush3.bf16.msra.mxu1 %v1439_v32 }
 0x39f   :  { %1366 = vmatprep.subr.bf16.mxu1 %v1441_v34 }
 0x3a2   :  { %1367 = vmatpush3.bf16.msra.mxu1 %v1441_v34 }
 0x3a3   :  { %1380 = vmatprep.subr.bf16.mxu1 %v1442_v50 }
 0x470   :  { %v1354_v17 = vpop.f32.mrb[8].mxu1 }
 0x471   :  { %v744_v18 = vadd.f32 %v1354_v17, %v1217_v16  ;;  %v735_v19 = vpop.f32.mrb[9].mxu1  ;;  %v1245_v17 = vld [vmem:[#allocation18 + $0x1] ss:$0 sm:$0xff] }
 0x472   :  { %v736_v20 = vadd.f32 %v1217_v16, %v735_v19  ;;  %v1355_v21 = vpop.f32.mrb[10].mxu1 }
 0x473   :  { %v747_v22 = vadd.f32 %v1355_v21, %v1217_v16  ;;  %v738_v23 = vpop.f32.mrb[11].mxu1  ;;  %v752_v25 = vmax.f32 %v744_v18, 0.0 }
 0x474   :  { %v739_v24 = vadd.f32 %v1217_v16, %v738_v23  ;;  %v750_v27 = vmax.f32 %v736_v20, 0.0 }
 0x475   :  { %v753_v26 = vmax.f32 %v747_v22, 0.0 }
 0x476   :  { %v751_v28 = vmax.f32 %v739_v24, 0.0 }
 0x477   :  { %v759_v29 = vpack.c.bf16 %v753_v26, %v752_v25 }
 0x478   :  { %v758_v30 = vpack.c.bf16 %v751_v28, %v750_v27 }
 0x47a   :  { %1360 = vmatprep.mubr.msk.bf16.mxu0 %vm337_vm3, %v758_v30 }
 0x47b   :  { %1361 = vmatmul.mubr.msk.bf16.vlgmr.msra.gmra.mrb[12].mxu0 %vm337_vm3, %v759_v29  ;;  %v1246_v29 = vld [vmem:[#allocation21 + $0x1] ss:$0 sm:$0xff] }
 0x47c   :  { %1373 = vmatpush3.bf16.msra.mxu0 %v1438_v31 }
 0x47d   :  { %1374 = vmatprep.subr.bf16.mxu0 %v1440_v33 }
 0x480   :  { %1375 = vmatpush3.bf16.msra.mxu0 %v1440_v33 }
 0x481   :  { %1388 = vmatprep.subr.bf16.mxu0 %v1444_v12 }
 0x54e   :  { %v1362_v35 = vpop.f32.mrb[12].mxu0 }
 0x54f   :  { %v812_v36 = vpop.f32.mrb[13].mxu0  ;;  %v829_v39 = vadd.f32 %v1362_v35, %v668_v10 }
 0x550   :  { %v827_v37 = vadd.f32 %v812_v36, %v662_v8  ;;  %v1363_v38 = vpop.f32.mrb[14].mxu0 }
 0x551   :  { %v830_v41 = vadd.f32 %v1363_v38, %v669_v11  ;;  %v815_v42 = vpop.f32.mrb[15].mxu0  ;;  %v840_v47 = vadd.f32 %v1226_v40, %v829_v39 }
 0x552   :  { %v828_v43 = vadd.f32 %v815_v42, %v663_v9  ;;  %v838_v45 = vadd.f32 %v1226_v40, %v827_v37 }
 0x553   :  { %v841_v44 = vadd.f32 %v1226_v40, %v830_v41 }
 0x554   :  { %v839_v46 = vadd.f32 %v1226_v40, %v828_v43 }
 0x555   :  { %v847_v49 = vpack.c.bf16 %v841_v44, %v840_v47 }
 0x556   :  { %v846_v48 = vpack.c.bf16 %v839_v46, %v838_v45 }
 0x558   :  { %1368 = vmatprep.mubr.msk.bf16.mxu1 %vm337_vm3, %v846_v48  ;;  %1376 = vmatprep.mubr.msk.bf16.mxu0 %vm337_vm3, %v846_v48 }
 0x559   :  { %1369 = vmatmul.mubr.msk.bf16.vlgmr.msra.gmra.mrb[12].mxu1 %vm337_vm3, %v847_v49  ;;  %1377 = vmatmul.mubr.msk.bf16.vlgmr.msra.gmra.mrb[16].mxu0 %vm337_vm3, %v847_v49 }
 0x55a   :  { %1381 = vmatpush3.bf16.msra.mxu1 %v1442_v50  ;;  %1389 = vmatpush3.bf16.msra.mxu0 %v1444_v12 }
 0x55b   :  { %1382 = vmatprep.subr.bf16.mxu1 %v1443_v51  ;;  %1390 = vmatprep.subr.bf16.mxu0 %v1445_v13 }
 0x55e   :  { %1383 = vmatpush3.bf16.msra.mxu1 %v1443_v51  ;;  %1391 = vmatpush3.bf16.msra.mxu0 %v1445_v13 }
 0x62c   :  { %v1370_v54 = vpop.f32.mrb[12].mxu1  ;;  %v1378_v55 = vpop.f32.mrb[16].mxu0 }
 0x62d   :  { %v916_v56 = vadd.f32 %v1370_v54, %v1227_v52  ;;  %v994_v57 = vadd.f32 %v1378_v55, %v1236_v53  ;;  %v907_v58 = vpop.f32.mrb[13].mxu1  ;;  %v985_v59 = vpop.f32.mrb[17].mxu0 }
 0x62e   :  { %v908_v60 = vadd.f32 %v1227_v52, %v907_v58  ;;  %v986_v61 = vadd.f32 %v1236_v53, %v985_v59  ;;  %v1371_v62 = vpop.f32.mrb[14].mxu1  ;;  %v1379_v63 = vpop.f32.mrb[18].mxu0 }
 0x62f   :  { %924 = vst [vmem:[%s2209_s21 + $0x10] sm:$0xff] %v916_v56  ;;  %v919_v0 = vadd.f32 %v1371_v62, %v1227_v52  ;;  %v997_v1 = vadd.f32 %v1379_v63, %v1236_v53  ;;  %v910_v2 = vpop.f32.mrb[15].mxu1  ;;  %v988_v3 = vpop.f32.mrb[19].mxu0  ;;  %v1002_v6 = vmax.f32 %v994_v57, 0.0 }
 0x630   :  { %922 = vst [vmem:[%s2209_s21] sm:$0xff] %v908_v60  ;;  %v911_v4 = vadd.f32 %v1227_v52, %v910_v2  ;;  %v989_v5 = vadd.f32 %v1236_v53, %v988_v3  ;;  %v1000_v8 = vmax.f32 %v986_v61, 0.0 }
 0x631   :  { %925 = vst [vmem:[%s2209_s21 + $0x18] sm:$0xff] %v919_v0  ;;  %v1003_v7 = vmax.f32 %v997_v1, 0.0 }
 0x632   :  { %923 = vst [vmem:[%s2209_s21 + $0x8] sm:$0xff] %v911_v4  ;;  %v1001_v9 = vmax.f32 %v989_v5, 0.0 }
 0x633   :  { %v1010_v10 = vpack.c.bf16 %v1003_v7, %v1002_v6 }
 0x634   :  { %v1009_v11 = vpack.c.bf16 %v1001_v9, %v1000_v8 }
 0x636   :  { %1384 = vmatprep.mubr.msk.bf16.mxu1 %vm337_vm3, %v1009_v11 }
 0x637   :  { %1385 = vmatmul.mubr.msk.bf16.vlgmr.msra.gmra.mrb[16].mxu1 %vm337_vm3, %v1010_v10 }
 0x70a   :  { %v1386_v14 = vpop.f32.mrb[16].mxu1 }
 0x70b   :  { %v1080_v15 = vadd.f32 %v1386_v14, %v840_v47  ;;  %v1063_v16 = vpop.f32.mrb[17].mxu1 }
 0x70c   :  { %v1078_v18 = vadd.f32 %v1063_v16, %v838_v45  ;;  %v1387_v19 = vpop.f32.mrb[18].mxu1 }
 0x70d   :  { %v1081_v20 = vadd.f32 %v1387_v19, %v841_v44  ;;  %v1066_v21 = vpop.f32.mrb[19].mxu1  ;;  %v1092_v23 = vadd.f32 %v1245_v17, %v1080_v15 }
 0x70e   :  { %v1079_v22 = vadd.f32 %v1066_v21, %v839_v46  ;;  %v1090_v25 = vadd.f32 %v1245_v17, %v1078_v18 }
 0x70f   :  { %v1093_v24 = vadd.f32 %v1245_v17, %v1081_v20 }
 0x710   :  { %v1091_v26 = vadd.f32 %v1245_v17, %v1079_v22 }
 0x711   :  { %v1100_v27 = vpack.c.bf16 %v1093_v24, %v1092_v23 }
 0x712   :  { %v1099_v28 = vpack.c.bf16 %v1091_v26, %v1090_v25 }
 0x714   :  { %1392 = vmatprep.mubr.msk.bf16.mxu0 %vm337_vm3, %v1099_v28 }
 0x715   :  { %1393 = vmatmul.mubr.msk.bf16.vlgmr.msra.gmra.mrb[20].mxu0 %vm337_vm3, %v1100_v27 }
 0x7e8   :  { %v1394_v30 = vpop.f32.mrb[20].mxu0 }
 0x7e9   :  { %v1170_v31 = vadd.f32 %v1394_v30, %v1246_v29  ;;  %v1161_v32 = vpop.f32.mrb[21].mxu0 }
 0x7ea   :  { %v1162_v33 = vadd.f32 %v1246_v29, %v1161_v32  ;;  %v1395_v34 = vpop.f32.mrb[22].mxu0 }
 0x7eb   :  { %1253 = vst [vmem:[%s2209_s21 + $0x30] sm:$0xff] %v1170_v31  ;;  %v1173_v35 = vadd.f32 %v1395_v34, %v1246_v29  ;;  %v1164_v36 = vpop.f32.mrb[23].mxu0 }
 0x7ec   :  { %1251 = vst [vmem:[%s2209_s21 + $0x20] sm:$0xff] %v1162_v33  ;;  %v1165_v37 = vadd.f32 %v1246_v29, %v1164_v36 }
 0x7ed   :  { %1254 = vst [vmem:[%s2209_s21 + $0x38] sm:$0xff] %v1173_v35 }
 0x7ee   :  { %1252 = vst [vmem:[%s2209_s21 + $0x28] sm:$0xff] %v1165_v37 }
 0x7ef   :  { %1185 = vsyncpa [#allocation3], 1 }
 0x7f0   :  { %1186 = vsyncpa [#allocation5], 1 }
 0x7f1   :  { %1187 = vsyncpa [#allocation8], 1 }
 0x7f2   :  { %1188 = vsyncpa [#allocation11], 1 }
 0x7f3   :  { %1189 = vsyncpa [#allocation14], 1 }
 0x7f4   :  { %1190 = vsyncpa [#allocation17], 1 }
 0x7f5   :  { %1191 = vsyncpa [#allocation20], 1 }

</bundles_post_ra>
